<compile_context>
chip_gen: v5e
topology: v5e:2x2
jax: 0.10.0
libtpu: 0.0.40
codegen_flags: <defaults>
</compile_context>

<pallas_src>
import functools
import math

import jax
import jax.numpy as jnp
from jax.experimental import pallas as pl
from jax.experimental.pallas import tpu as pltpu

LN_EPS = 1e-5
INV_SQRT2 = 1.0 / math.sqrt(2.0)


def _round_up(x, m):
    return ((x + m - 1) // m) * m


def _layernorm_f32(x_f32, gamma, beta, d_true):
    """Single-pass LN over the last axis; padded columns are zero so sums over
    the padded tile equal sums over the real columns (divide by d_true)."""
    s = jnp.sum(x_f32, axis=-1, keepdims=True)
    sq = jnp.sum(x_f32 * x_f32, axis=-1, keepdims=True)
    mean = s * (1.0 / d_true)
    var = sq * (1.0 / d_true) - mean * mean
    inv = jax.lax.rsqrt(var + LN_EPS)
    # gamma/beta are f32 and zero in padded columns -> xn padded columns == 0.
    return (x_f32 - mean) * inv * gamma + beta


def _gelu(h, approx):
    if approx:
        return jax.nn.gelu(h, approximate=True)          # EUP-friendly (v5e)
    # exact erf-based GELU == torch nn.GELU() default
    return 0.5 * h * (1.0 + jax.lax.erf(h * INV_SQRT2))


# --------------------------------------------------------------------------
# FUSED kernel: whole hidden dim processed in one pass, no scratch buffers.
# Grid = (row tiles,)
# --------------------------------------------------------------------------
def mlp_fused_kernel(x_ref, gamma_ref, beta_ref, w1_ref, b1_ref, w2_ref,
                     b2_ref, o_ref, *, d_true, approx_gelu, compute_dtype):
    x = x_ref[...].astype(jnp.float32)
    xn = _layernorm_f32(x, gamma_ref[...], beta_ref[...], d_true)
    h = jnp.dot(xn.astype(compute_dtype), w1_ref[...],
                preferred_element_type=jnp.float32) + b1_ref[...]
    h = _gelu(h, approx_gelu)
    y = jnp.dot(h.astype(compute_dtype), w2_ref[...],
                preferred_element_type=jnp.float32) + b2_ref[...]
    o_ref[...] = y.astype(o_ref.dtype)


# --------------------------------------------------------------------------
# CHUNKED kernel: hidden dim tiled along a second ("arbitrary") grid axis.
# Grid = (row tiles, H chunks); axis 1 is the accumulation axis.
# --------------------------------------------------------------------------
def mlp_chunked_kernel(x_ref, gamma_ref, beta_ref, w1_ref, b1_ref, w2_ref,
                       b2_ref, o_ref, acc_ref, xn_ref, *, d_true, approx_gelu):
    k = pl.program_id(1)

    # ---- per-row-tile prologue: LayerNorm once, zero the accumulator ----
    @pl.when(k == 0)
    def _():
        x = x_ref[...].astype(jnp.float32)
        xn = _layernorm_f32(x, gamma_ref[...], beta_ref[...], d_true)
        xn_ref[...] = xn.astype(xn_ref.dtype)
        acc_ref[...] = jnp.zeros_like(acc_ref)

    # ---- fc1 chunk + GELU (f32), then accumulate fc2 chunk (f32 acc) ----
    h = jnp.dot(xn_ref[...], w1_ref[...],
                preferred_element_type=jnp.float32) + b1_ref[...]
    h = _gelu(h, approx_gelu)
    acc_ref[...] += jnp.dot(h.astype(w2_ref.dtype), w2_ref[...],
                            preferred_element_type=jnp.float32)

    # ---- per-row-tile epilogue: bias + cast + store (lane-dense O) ----
    @pl.when(k == pl.num_programs(1) - 1)
    def _():
        o_ref[...] = (acc_ref[...] + b2_ref[...]).astype(o_ref.dtype)


def mlp_forward(x, gamma, beta, w1, b1, w2, b2, *,
                tm=256, th=512,
                compute_dtype=jnp.float32,
                approx_gelu=False,
                vmem_limit_bytes=48 * 1024 * 1024):
    """x: (M, D).  w1: (D, H), b1: (H,), w2: (H, O), b2: (O,).

    tm            : row tile (multiple of 8; clamped/padded for small M)
    th            : hidden-dim chunk (rounded to a multiple of 128).
                    If the whole (padded) hidden dim fits in one chunk, the
                    fused single-pass kernel is used (no scratch buffers).
    compute_dtype : dtype fed to the MXU (f32 or bf16); accumulation is f32.
    """
    M, D = x.shape
    H = w1.shape[1]
    O = w2.shape[1]

    # ---- padded, lane-dense geometry ----
    tm_eff = _round_up(min(tm, _round_up(M, 8)), 8)
    M_pad = _round_up(M, tm_eff)

    D_pad = _round_up(D, 128)
    O_pad = _round_up(O, 128)
    th_eff = _round_up(min(th, _round_up(H, 128)), 128)
    H_pad = _round_up(H, th_eff)

    # ---- pad operands (zeros never change the math; see kernel comments) ----
    def pad2(a, r, c, dtype):
        a = a.astype(dtype)
        pr, pc = r - a.shape[0], c - a.shape[1]
        if pr or pc:
            a = jnp.pad(a, ((0, pr), (0, pc)))
        return a

    x_p = pad2(x, M_pad, D_pad, x.dtype)
    gamma_p = pad2(gamma.reshape(1, D), 1, D_pad, jnp.float32)
    beta_p = pad2(beta.reshape(1, D), 1, D_pad, jnp.float32)
    w1_p = pad2(w1, D_pad, H_pad, compute_dtype)
    b1_p = pad2(b1.reshape(1, H), 1, H_pad, jnp.float32)
    w2_p = pad2(w2, H_pad, O_pad, compute_dtype)
    b2_p = pad2(b2.reshape(1, O), 1, O_pad, jnp.float32)

    fused = (H_pad <= th_eff)

    if fused:
        grid = (M_pad // tm_eff,)
        kernel = functools.partial(mlp_fused_kernel, d_true=float(D),
                                   approx_gelu=approx_gelu,
                                   compute_dtype=compute_dtype)
        grid_spec = pltpu.PrefetchScalarGridSpec(
            num_scalar_prefetch=0,
            grid=grid,
            in_specs=[
                pl.BlockSpec((tm_eff, D_pad), lambda i: (i, 0)),   # x rows
                pl.BlockSpec((1, D_pad), lambda i: (0, 0)),        # LN gamma
                pl.BlockSpec((1, D_pad), lambda i: (0, 0)),        # LN beta
                pl.BlockSpec((D_pad, H_pad), lambda i: (0, 0)),    # fc1 W
                pl.BlockSpec((1, H_pad), lambda i: (0, 0)),        # fc1 b
                pl.BlockSpec((H_pad, O_pad), lambda i: (0, 0)),    # fc2 W
                pl.BlockSpec((1, O_pad), lambda i: (0, 0)),        # fc2 b
            ],
            out_specs=pl.BlockSpec((tm_eff, O_pad), lambda i: (i, 0)),
            scratch_shapes=[],
        )
        dim_sem = ("parallel",)
    else:
        grid = (M_pad // tm_eff, H_pad // th_eff)
        kernel = functools.partial(mlp_chunked_kernel, d_true=float(D),
                                   approx_gelu=approx_gelu)
        grid_spec = pltpu.PrefetchScalarGridSpec(
            num_scalar_prefetch=0,
            grid=grid,
            in_specs=[
                pl.BlockSpec((tm_eff, D_pad), lambda i, k: (i, 0)),  # x rows
                pl.BlockSpec((1, D_pad), lambda i, k: (0, 0)),       # LN gamma
                pl.BlockSpec((1, D_pad), lambda i, k: (0, 0)),       # LN beta
                pl.BlockSpec((D_pad, th_eff), lambda i, k: (0, k)),  # fc1 W chunk
                pl.BlockSpec((1, th_eff), lambda i, k: (0, k)),      # fc1 b chunk
                pl.BlockSpec((th_eff, O_pad), lambda i, k: (k, 0)),  # fc2 W chunk
                pl.BlockSpec((1, O_pad), lambda i, k: (0, 0)),       # fc2 b
            ],
            out_specs=pl.BlockSpec((tm_eff, O_pad), lambda i, k: (i, 0)),
            scratch_shapes=[
                pltpu.VMEM((tm_eff, O_pad), jnp.float32),    # fc2 accumulator
                pltpu.VMEM((tm_eff, D_pad), compute_dtype),  # cached LN output
            ],
        )
        dim_sem = ("parallel", "arbitrary")

    out_p = pl.pallas_call(
        kernel,
        out_shape=jax.ShapeDtypeStruct((M_pad, O_pad), x.dtype),
        grid_spec=grid_spec,
        compiler_params=pltpu.CompilerParams(
            dimension_semantics=dim_sem,
            vmem_limit_bytes=vmem_limit_bytes,
        ),
    )(x_p, gamma_p, beta_p, w1_p, b1_p, w2_p, b2_p)

    return out_p[:M, :O]


def init_params(key, in_features, hidden_features, out_features):
    """Deterministic init mirroring the PyTorch module's _init_weights."""
    k1, k2, k3, k4 = jax.random.split(key, 4)

    limit1 = math.sqrt(6.0 / (in_features + hidden_features))
    w1_t = jax.random.uniform(k1, (hidden_features, in_features),
                              minval=-limit1, maxval=limit1, dtype=jnp.float32)
    bound1 = 1.0 / math.sqrt(in_features)
    b1 = jax.random.uniform(k2, (hidden_features,),
                            minval=-bound1, maxval=bound1, dtype=jnp.float32)

    limit2 = math.sqrt(6.0 / (hidden_features + out_features))
    w2_t = jax.random.uniform(k3, (out_features, hidden_features),
                              minval=-limit2, maxval=limit2, dtype=jnp.float32)
    bound2 = 1.0 / math.sqrt(hidden_features)
    b2 = jax.random.uniform(k4, (out_features,),
                            minval=-bound2, maxval=bound2, dtype=jnp.float32)

    gamma = jnp.ones((in_features,), jnp.float32)   # nn.LayerNorm default weight
    beta = jnp.zeros((in_features,), jnp.float32)   # nn.LayerNorm default bias

    return gamma, beta, w1_t.T, b1, w2_t.T, b2


def mlp_reference(x, gamma, beta, w1, b1, w2, b2):
    mean = jnp.mean(x, axis=-1, keepdims=True)
    var = jnp.mean((x - mean) ** 2, axis=-1, keepdims=True)
    xn = (x - mean) / jnp.sqrt(var + LN_EPS) * gamma + beta
    h = xn @ w1 + b1
    h = 0.5 * h * (1.0 + jax.lax.erf(h / math.sqrt(2.0)))
    return h @ w2 + b2


if __name__ == "__main__":
    key = jax.random.PRNGKey(0)
    kx, kp, kx2, kp2 = jax.random.split(key, 4)

    # ---- Small shapes consistent with the module: batch=2, seq=8,
    #      in_features=32, hidden_features=64, out_features=32 (fused path) ----
    B, N, D, H = 2, 8, 32, 64
    x = jax.random.normal(kx, (B, N, D), dtype=jnp.float32)
    gamma, beta, w1, b1, w2, b2 = init_params(kp, D, H, D)

    x2d = x.reshape(B * N, D)                    # token-major (M, D), M = B*N
    ref = mlp_reference(x2d, gamma, beta, w1, b1, w2, b2)

    # f32 MXU path (exact match to the PyTorch semantics)
    out_f32 = mlp_forward(x2d, gamma, beta, w1, b1, w2, b2,
                          tm=256, th=512, compute_dtype=jnp.float32)
    jax.block_until_ready(out_f32)
    assert jnp.allclose(out_f32, ref, atol=1e-4, rtol=1e-4), "f32 mismatch vs reference"

    # bf16 MXU path (recommended on v5e/v6e/v7x; f32 accumulation)
    out_bf16 = mlp_forward(x2d, gamma, beta, w1, b1, w2, b2,
                           tm=256, th=512, compute_dtype=jnp.bfloat16)
    jax.block_until_ready(out_bf16)
    assert jnp.allclose(out_bf16, ref, atol=5e-2, rtol=5e-2), "bf16 mismatch vs reference"

    out = out_f32.reshape(B, N, D)
    jax.block_until_ready(out)

    # ---- Exercise the chunked (H-tiled) path with a larger hidden dim ----
    D2, H2 = 64, 384
    x2 = jax.random.normal(kx2, (B * N, D2), dtype=jnp.float32)
    g2, be2, w1b, b1b, w2b, b2b = init_params(kp2, D2, H2, D2)
    ref2 = mlp_reference(x2, g2, be2, w1b, b1b, w2b, b2b)
    out2 = mlp_forward(x2, g2, be2, w1b, b1b, w2b, b2b,
                       tm=256, th=128, compute_dtype=jnp.float32)
    jax.block_until_ready(out2)
    assert jnp.allclose(out2, ref2, atol=1e-4, rtol=1e-4), "chunked mismatch vs reference"

    print("KERNEL_OK")
</pallas_src>

<mosaic_0001>
module attributes {stable_mosaic.version = 11 : i64} {
  func.func @mlp_fused_kernel(%arg0: i32, %arg1: memref<16x128xf32, #tpu.memory_space<vmem>>, %arg2: memref<1x128xf32, #tpu.memory_space<vmem>>, %arg3: memref<1x128xf32, #tpu.memory_space<vmem>>, %arg4: memref<128x128xf32, #tpu.memory_space<vmem>>, %arg5: memref<1x128xf32, #tpu.memory_space<vmem>>, %arg6: memref<128x128xf32, #tpu.memory_space<vmem>>, %arg7: memref<1x128xf32, #tpu.memory_space<vmem>>, %arg8: memref<16x128xf32, #tpu.memory_space<vmem>>) attributes {dimension_semantics = [#tpu.dimension_semantics<parallel>], iteration_bounds = array<i64: 1>, scalar_prefetch = 0 : i64, scratch_operands = 0 : i64, tpu.core_type = #tpu.core_type<tc>, window_params = [{transform_indices = @transform_0, window_bounds = array<i64: 16, 128>}, {pipeline_mode = #tpu.pipeline_mode<synchronous>, transform_indices = @transform_1, window_bounds = array<i64: 1, 128>}, {pipeline_mode = #tpu.pipeline_mode<synchronous>, transform_indices = @transform_2, window_bounds = array<i64: 1, 128>}, {pipeline_mode = #tpu.pipeline_mode<synchronous>, transform_indices = @transform_3, window_bounds = array<i64: 128, 128>}, {pipeline_mode = #tpu.pipeline_mode<synchronous>, transform_indices = @transform_4, window_bounds = array<i64: 1, 128>}, {pipeline_mode = #tpu.pipeline_mode<synchronous>, transform_indices = @transform_5, window_bounds = array<i64: 128, 128>}, {pipeline_mode = #tpu.pipeline_mode<synchronous>, transform_indices = @transform_6, window_bounds = array<i64: 1, 128>}, {transform_indices = @transform_7, window_bounds = array<i64: 16, 128>}]} {
    %c0 = arith.constant 0 : index
    %c0_0 = arith.constant 0 : index
    %0 = vector.load %arg1[%c0, %c0_0] : memref<16x128xf32, #tpu.memory_space<vmem>>, vector<16x128xf32>
    %c0_1 = arith.constant 0 : index
    %c0_2 = arith.constant 0 : index
    %1 = vector.load %arg2[%c0_1, %c0_2] : memref<1x128xf32, #tpu.memory_space<vmem>>, vector<1x128xf32>
    %c0_3 = arith.constant 0 : index
    %c0_4 = arith.constant 0 : index
    %2 = vector.load %arg3[%c0_3, %c0_4] : memref<1x128xf32, #tpu.memory_space<vmem>>, vector<1x128xf32>
    %cst = arith.constant dense<0.000000e+00> : vector<16xf32>
    %3 = vector.multi_reduction <add>, %0, %cst [1] : vector<16x128xf32> to vector<16xf32>
    %4 = vector.shape_cast %3 : vector<16xf32> to vector<16x1xf32>
    %5 = arith.mulf %0, %0 : vector<16x128xf32>
    %cst_5 = arith.constant dense<0.000000e+00> : vector<16xf32>
    %6 = vector.multi_reduction <add>, %5, %cst_5 [1] : vector<16x128xf32> to vector<16xf32>
    %7 = vector.shape_cast %6 : vector<16xf32> to vector<16x1xf32>
    %cst_6 = arith.constant 3.125000e-02 : f32
    %8 = vector.broadcast %cst_6 : f32 to vector<16x1xf32>
    %9 = arith.mulf %4, %8 : vector<16x1xf32>
    %cst_7 = arith.constant 3.125000e-02 : f32
    %10 = vector.broadcast %cst_7 : f32 to vector<16x1xf32>
    %11 = arith.mulf %7, %10 : vector<16x1xf32>
    %12 = arith.mulf %9, %9 : vector<16x1xf32>
    %13 = arith.subf %11, %12 : vector<16x1xf32>
    %cst_8 = arith.constant 9.99999974E-6 : f32
    %14 = vector.broadcast %cst_8 : f32 to vector<16x1xf32>
    %15 = arith.addf %13, %14 : vector<16x1xf32>
    %16 = math.rsqrt %15 : vector<16x1xf32>
    %17 = vector.broadcast %9 : vector<16x1xf32> to vector<16x128xf32>
    %18 = arith.subf %0, %17 : vector<16x128xf32>
    %19 = vector.broadcast %16 : vector<16x1xf32> to vector<16x128xf32>
    %20 = arith.mulf %18, %19 : vector<16x128xf32>
    %21 = vector.broadcast %1 : vector<1x128xf32> to vector<16x128xf32>
    %22 = arith.mulf %20, %21 : vector<16x128xf32>
    %23 = vector.broadcast %2 : vector<1x128xf32> to vector<16x128xf32>
    %24 = arith.addf %22, %23 : vector<16x128xf32>
    %c0_9 = arith.constant 0 : index
    %c0_10 = arith.constant 0 : index
    %25 = vector.load %arg4[%c0_9, %c0_10] : memref<128x128xf32, #tpu.memory_space<vmem>>, vector<128x128xf32>
    %cst_11 = arith.constant dense<0.000000e+00> : vector<16x128xf32>
    %26 = tpu.matmul %24, %25, %cst_11 {dimension_numbers = #tpu.dot_dimension_numbers<[1], [0], [0], [1], [0, 0, 1, 1], [], []>} : vector<16x128xf32>, vector<128x128xf32>, vector<16x128xf32> -> vector<16x128xf32>
    %c0_12 = arith.constant 0 : index
    %c0_13 = arith.constant 0 : index
    %27 = vector.load %arg5[%c0_12, %c0_13] : memref<1x128xf32, #tpu.memory_space<vmem>>, vector<1x128xf32>
    %28 = vector.broadcast %27 : vector<1x128xf32> to vector<16x128xf32>
    %29 = arith.addf %26, %28 : vector<16x128xf32>
    %cst_14 = arith.constant 5.000000e-01 : f32
    %30 = vector.broadcast %cst_14 : f32 to vector<16x128xf32>
    %31 = arith.mulf %30, %29 : vector<16x128xf32>
    %cst_15 = arith.constant 0.707106769 : f32
    %32 = vector.broadcast %cst_15 : f32 to vector<16x128xf32>
    %33 = arith.mulf %29, %32 : vector<16x128xf32>
    %34 = math.erf %33 : vector<16x128xf32>
    %cst_16 = arith.constant 1.000000e+00 : f32
    %35 = vector.broadcast %cst_16 : f32 to vector<16x128xf32>
    %36 = arith.addf %35, %34 : vector<16x128xf32>
    %37 = arith.mulf %31, %36 : vector<16x128xf32>
    %c0_17 = arith.constant 0 : index
    %c0_18 = arith.constant 0 : index
    %38 = vector.load %arg6[%c0_17, %c0_18] : memref<128x128xf32, #tpu.memory_space<vmem>>, vector<128x128xf32>
    %cst_19 = arith.constant dense<0.000000e+00> : vector<16x128xf32>
    %39 = tpu.matmul %37, %38, %cst_19 {dimension_numbers = #tpu.dot_dimension_numbers<[1], [0], [0], [1], [0, 0, 1, 1], [], []>} : vector<16x128xf32>, vector<128x128xf32>, vector<16x128xf32> -> vector<16x128xf32>
    %c0_20 = arith.constant 0 : index
    %c0_21 = arith.constant 0 : index
    %40 = vector.load %arg7[%c0_20, %c0_21] : memref<1x128xf32, #tpu.memory_space<vmem>>, vector<1x128xf32>
    %41 = vector.broadcast %40 : vector<1x128xf32> to vector<16x128xf32>
    %42 = arith.addf %39, %41 : vector<16x128xf32>
    %c0_22 = arith.constant 0 : index
    %c0_23 = arith.constant 0 : index
    %43 = vector.load %arg8[%c0_22, %c0_23] : memref<16x128xf32, #tpu.memory_space<vmem>>, vector<16x128xf32>
    tpu.vector_store %arg8[%c0_22, %c0_23], %42 {strides = array<i32>} : memref<16x128xf32, #tpu.memory_space<vmem>>, vector<16x128xf32>,
    return
  }
  func.func @transform_0(%arg0: i32) -> (i32, i32) {
    %c0_i32 = arith.constant 0 : i32
    %c0_i32_0 = arith.constant 0 : i32
    return %arg0, %c0_i32 : i32, i32
  }
  func.func @transform_1(%arg0: i32) -> (i32, i32) {
    %c0_i32 = arith.constant 0 : i32
    %c0_i32_0 = arith.constant 0 : i32
    %c0_i32_1 = arith.constant 0 : i32
    return %c0_i32, %c0_i32_0 : i32, i32
  }
  func.func @transform_2(%arg0: i32) -> (i32, i32) {
    %c0_i32 = arith.constant 0 : i32
    %c0_i32_0 = arith.constant 0 : i32
    %c0_i32_1 = arith.constant 0 : i32
    return %c0_i32, %c0_i32_0 : i32, i32
  }
  func.func @transform_3(%arg0: i32) -> (i32, i32) {
    %c0_i32 = arith.constant 0 : i32
    %c0_i32_0 = arith.constant 0 : i32
    %c0_i32_1 = arith.constant 0 : i32
    return %c0_i32, %c0_i32_0 : i32, i32
  }
  func.func @transform_4(%arg0: i32) -> (i32, i32) {
    %c0_i32 = arith.constant 0 : i32
    %c0_i32_0 = arith.constant 0 : i32
    %c0_i32_1 = arith.constant 0 : i32
    return %c0_i32, %c0_i32_0 : i32, i32
  }
  func.func @transform_5(%arg0: i32) -> (i32, i32) {
    %c0_i32 = arith.constant 0 : i32
    %c0_i32_0 = arith.constant 0 : i32
    %c0_i32_1 = arith.constant 0 : i32
    return %c0_i32, %c0_i32_0 : i32, i32
  }
  func.func @transform_6(%arg0: i32) -> (i32, i32) {
    %c0_i32 = arith.constant 0 : i32
    %c0_i32_0 = arith.constant 0 : i32
    %c0_i32_1 = arith.constant 0 : i32
    return %c0_i32, %c0_i32_0 : i32, i32
  }
  func.func @transform_7(%arg0: i32) -> (i32, i32) {
    %c0_i32 = arith.constant 0 : i32
    %c0_i32_0 = arith.constant 0 : i32
    return %arg0, %c0_i32 : i32, i32
  }
}

</mosaic_0001>

<bundles_post_ra>
// kernel: tpu_custom_call.1
= control target key start
LH: loop header
LB: loop body
LE: loop exit
PB: predicated region body
PF: predicated region fallthrough
CT: control target
= control target key end

     0   :  { %12 = vsyncpa [#allocation3], 0  ;;  %s649_s0 = inlined_call_operand.hbm [shape: f32[16,128], index: 0, kind: input, shape index: {}]   ;;  %s650_s1 = inlined_call_operand.hbm [shape: f32[1,128], index: 1, kind: input, shape index: {}]   ;;  %s651_s2 = inlined_call_operand.vmem [shape: f32[1,128], index: 2, kind: input, shape index: {}]   ;;  %s652_s3 = inlined_call_operand.hbm [shape: f32[128,128], index: 3, kind: input, shape index: {}]   ;;  %s653_s4 = inlined_call_operand.vmem [shape: f32[1,128], index: 4, kind: input, shape index: {}]   ;;  %s654_s5 = inlined_call_operand.hbm [shape: f32[128,128], index: 5, kind: input, shape index: {}]   ;;  %s655_s6 = inlined_call_operand.vmem [shape: f32[1,128], index: 6, kind: input, shape index: {}]   ;;  %s656_s7 = inlined_call_operand.hbm [shape: f32[16,128], index: 7, kind: output, shape index: {}]  }
   0x1   :  { %13 = vsyncpa [#allocation6], 0 }
   0x2   :  { %14 = vsyncpa [#allocation9], 0  ;;  %s34_s26 = sshll.u32 %s650_s1, 4  ;;  %s35_s26 = int_to_ptr.hbm [resolvable:$true] %s34_s26 }
   0x3   :  { %15 = vsyncpa [#allocation4], 0  ;;  %s524_s27 = smov [#allocation5]   ;;  %s20_s8 = sshll.u32 %s649_s0, 4  ;;  %s21_s8 = int_to_ptr.hbm [resolvable:$true] %s20_s8 }
   0x4   :  { %s36_s28 = sshll.u32 %s524_s27, 4  ;;  %s525_s9 = smov [#allocation2]   ;;  %s37_s28 = int_to_ptr.vmem [resolvable:$true] %s36_s28 }
   0x5   :  { %39 = dma.hbm_to_vmem [thread:$0]  %s35_s26, 16, %s37_s28, [#allocation6]  }
   0x6   :  { %s22_s10 = sshll.u32 %s525_s9, 4  ;;  %s526_s11 = smov 128   ;;  %s23_s10 = int_to_ptr.vmem [resolvable:$true] %s22_s10 }
   0x7   :  { %s527_s12 = smov 8   ;;  %s46_s14 = sshll.u32 %s652_s3, 4  ;;  %s47_s14 = int_to_ptr.hbm [resolvable:$true] %s46_s14 }
   0x8   :  { %28 = dma.hbm_to_vmem [thread:$0]  %s21_s8, 256, %s23_s10, [#allocation3], %s526_s11, %s526_s11, %s527_s12  }
   0x9   :  { %s528_s15 = smov [#allocation7]   ;;  %s61_s18 = sshll.u32 %s654_s5, 4  ;;  %s62_s18 = int_to_ptr.hbm [resolvable:$true] %s61_s18 }
   0xa   :  { %s48_s16 = sshll.u32 %s528_s15, 4  ;;  %s529_s19 = smov [#allocation8]   ;;  %s49_s16 = int_to_ptr.vmem [resolvable:$true] %s48_s16 }
   0xb   :  { %54 = dma.hbm_to_vmem [thread:$0]  %s47_s14, 2048, %s49_s16, [#allocation6], %s526_s11, %s526_s11, %s527_s12  }
   0xc   :  { %s63_s20 = sshll.u32 %s529_s19, 4  ;;  %s64_s20 = int_to_ptr.vmem [resolvable:$true] %s63_s20 }
   0xd   :  { %69 = dma.hbm_to_vmem [thread:$0]  %s62_s18, 2048, %s64_s20, [#allocation9], %s526_s11, %s526_s11, %s527_s12  }
   0xe   :  { %516 = dma.done.wait [#allocation3], 256  }
   0xf   :  { %517 = vsyncadd [#allocation3], 4294967040 }
  0x10   :  { %518 = dma.done.wait [#allocation6], 2064  }
  0x11   :  { %519 = vsyncadd [#allocation6], 4294965232 }
  0x12   :  { %520 = dma.done.wait [#allocation9], 2048  }
  0x13   :  { %521 = vsyncadd [#allocation9], 4294965248  ;;  %v592_v0 = vld [vmem:[#allocation2 + $0x8] sm:$0xff]  ;;  %v594_v1 = vld [vmem:[#allocation2] sm:$0xff]  ;;  %s530_s23 = smov [#allocation10]   ;;  %s328_s27 = sshll.u32 %s656_s7, 4  ;;  %s329_s27 = int_to_ptr.hbm [resolvable:$true] %s328_s27 }
  0x14   :  { %94 = vadd.xlane.f32.xlu0 %v592_v0  ;;  %92 = vadd.xlane.f32.xlu1 %v594_v1  ;;  %v97_v2 = vmul.f32 %v592_v0, %v592_v0  ;;  %v96_v3 = vmul.f32 %v594_v1, %v594_v1  ;;  %v161_v4 = vld [vmem:[#allocation7 + $0x78] sm:$0xff]  ;;  %v160_v5 = vld [vmem:[#allocation7 + $0x70] sm:$0xff]  ;;  %v159_v6 = vld [vmem:[#allocation7 + $0x68] sm:$0xff]  ;;  %s326_s24 = sshll.u32 %s530_s23, 4  ;;  %s327_s24 = int_to_ptr.vmem [resolvable:$true] %s326_s24 }
  0x15   :  { %166 = vmatpush.msra.mxu0 %v161_v4  ;;  %345 = vmatpush.msra.mxu2 %v161_v4  ;;  %v158_v7 = vld [vmem:[#allocation7 + $0x60] sm:$0xff]  ;;  %v157_v8 = vld [vmem:[#allocation7 + $0x58] sm:$0xff]  ;;  %v156_v9 = vld [vmem:[#allocation7 + $0x50] sm:$0xff] }
  0x16   :  { %v155_v10 = vld [vmem:[#allocation7 + $0x48] sm:$0xff]  ;;  %v154_v11 = vld [vmem:[#allocation7 + $0x40] sm:$0xff]  ;;  %v153_v12 = vld [vmem:[#allocation7 + $0x38] sm:$0xff] }
  0x17   :  { %167 = vmatpush.msra.mxu0 %v160_v5  ;;  %346 = vmatpush.msra.mxu2 %v160_v5  ;;  %v152_v13 = vld [vmem:[#allocation7 + $0x30] sm:$0xff]  ;;  %v151_v14 = vld [vmem:[#allocation7 + $0x28] sm:$0xff]  ;;  %v150_v15 = vld [vmem:[#allocation7 + $0x20] sm:$0xff] }
  0x18   :  { %v149_v16 = vld [vmem:[#allocation7 + $0x18] sm:$0xff]  ;;  %v148_v19 = vld [vmem:[#allocation7 + $0x10] sm:$0xff]  ;;  %v147_v20 = vld [vmem:[#allocation7 + $0x8] sm:$0xff] }
  0x19   :  { %168 = vmatpush.msra.mxu0 %v159_v6  ;;  %347 = vmatpush.msra.mxu2 %v159_v6  ;;  %v146_v22 = vld [vmem:[#allocation7] sm:$0xff]  ;;  %v384_v47 = vld [vmem:[#allocation5] ss:$0 sm:$0xff]  ;;  %v385_v51 = vld [vmem:[%s651_s2] ss:$0 sm:$0xff] }
  0x1a   :  { %v292_v58 = vld [vmem:[#allocation8 + $0x78] sm:$0xff]  ;;  %v291_v59 = vld [vmem:[#allocation8 + $0x70] sm:$0xff]  ;;  %v290_v60 = vld [vmem:[#allocation8 + $0x68] sm:$0xff] }
  0x1b   :  { %169 = vmatpush.msra.mxu0 %v158_v7  ;;  %348 = vmatpush.msra.mxu2 %v158_v7  ;;  %v289_v61 = vld [vmem:[#allocation8 + $0x60] sm:$0xff]  ;;  %v386_v62 = vld [vmem:[%s653_s4] ss:$0 sm:$0xff]  ;;  %v288_v63 = vld [vmem:[#allocation8 + $0x58] sm:$0xff] }
  0x1c   :  { %100 = vadd.xlane.f32.xlu0 %v97_v2  ;;  %98 = vadd.xlane.f32.xlu1 %v96_v3  ;;  %v286_v3 = vld [vmem:[#allocation8 + $0x48] sm:$0xff]  ;;  %v285_v4 = vld [vmem:[#allocation8 + $0x40] sm:$0xff]  ;;  %v284_v6 = vld [vmem:[#allocation8 + $0x38] sm:$0xff] }
  0x1d   :  { %170 = vmatpush.msra.mxu0 %v157_v8  ;;  %349 = vmatpush.msra.mxu2 %v157_v8 }
  0x1e   :  { %297 = vmatpush.msra.mxu1 %v292_v58  ;;  %361 = vmatpush.msra.mxu3 %v292_v58 }
  0x1f   :  { %171 = vmatpush.msra.mxu0 %v156_v9  ;;  %350 = vmatpush.msra.mxu2 %v156_v9 }
  0x20   :  { %298 = vmatpush.msra.mxu1 %v291_v59  ;;  %362 = vmatpush.msra.mxu3 %v291_v59 }
  0x21   :  { %172 = vmatpush.msra.mxu0 %v155_v10  ;;  %351 = vmatpush.msra.mxu2 %v155_v10  ;;  %v283_v10 = vld [vmem:[#allocation8 + $0x30] sm:$0xff] }
  0x22   :  { %299 = vmatpush.msra.mxu1 %v290_v60  ;;  %363 = vmatpush.msra.mxu3 %v290_v60 }
  0x23   :  { %173 = vmatpush.msra.mxu0 %v154_v11  ;;  %352 = vmatpush.msra.mxu2 %v154_v11 }
  0x24   :  { %300 = vmatpush.msra.mxu1 %v289_v61  ;;  %364 = vmatpush.msra.mxu3 %v289_v61 }
  0x25   :  { %174 = vmatpush.msra.mxu0 %v153_v12  ;;  %353 = vmatpush.msra.mxu2 %v153_v12 }
  0x26   :  { %301 = vmatpush.msra.mxu1 %v288_v63  ;;  %365 = vmatpush.msra.mxu3 %v288_v63 }
  0x27   :  { %175 = vmatpush.msra.mxu0 %v152_v13  ;;  %354 = vmatpush.msra.mxu2 %v152_v13  ;;  %v282_v13 = vld [vmem:[#allocation8 + $0x28] sm:$0xff] }
  0x29   :  { %176 = vmatpush.msra.mxu0 %v151_v14  ;;  %355 = vmatpush.msra.mxu2 %v151_v14 }
  0x2b   :  { %177 = vmatpush.msra.mxu0 %v150_v15  ;;  %356 = vmatpush.msra.mxu2 %v150_v15 }
  0x2d   :  { %178 = vmatpush.msra.mxu0 %v149_v16  ;;  %357 = vmatpush.msra.mxu2 %v149_v16 }
  0x2f   :  { %179 = vmatpush.msra.mxu0 %v148_v19  ;;  %358 = vmatpush.msra.mxu2 %v148_v19 }
  0x31   :  { %180 = vmatpush.msra.mxu0 %v147_v20  ;;  %359 = vmatpush.msra.mxu2 %v147_v20 }
  0x33   :  { %181 = vmatpush.msra.mxu0 %v146_v22  ;;  %360 = vmatpush.msra.mxu2 %v146_v22 }
  0x87   :  { %v95_v17 = vpop.xlane.xlu0 %94  ;;  %v93_v18 = vpop.xlane.xlu1 %92 }
  0x88   :  { %v102_v21 = vmul.f32 0.03125, %v93_v18  ;;  %v103_v23 = vmul.f32 0.03125, %v95_v17  ;;  %v281_v17 = vld [vmem:[#allocation8 + $0x20] sm:$0xff] }
  0x8a   :  { %v106_v24 = vmul.f32 %v102_v21, %v102_v21  ;;  %v107_v27 = vmul.f32 %v103_v23, %v103_v23  ;;  %v133_v45 = vsub.f32 %v592_v0, %v103_v23  ;;  %v132_v48 = vsub.f32 %v594_v1, %v102_v21  ;;  %v287_v1 = vld [vmem:[#allocation8 + $0x50] sm:$0xff]  ;;  %v280_v21 = vld [vmem:[#allocation8 + $0x18] sm:$0xff] }
  0x8b   :  { %302 = vmatpush.msra.mxu1 %v287_v1  ;;  %366 = vmatpush.msra.mxu3 %v287_v1 }
  0x8d   :  { %303 = vmatpush.msra.mxu1 %v286_v3  ;;  %367 = vmatpush.msra.mxu3 %v286_v3 }
  0x8f   :  { %v101_v25 = vpop.xlane.xlu0 %100  ;;  %v99_v26 = vpop.xlane.xlu1 %98  ;;  %304 = vmatpush.msra.mxu1 %v285_v4  ;;  %368 = vmatpush.msra.mxu3 %v285_v4 }
  0x90   :  { %v105_v28 = vmul.f32 0.03125, %v101_v25  ;;  %v104_v29 = vmul.f32 0.03125, %v99_v26  ;;  %v279_v25 = vld [vmem:[#allocation8 + $0x10] sm:$0xff] }
  0x91   :  { %305 = vmatpush.msra.mxu1 %v284_v6  ;;  %369 = vmatpush.msra.mxu3 %v284_v6 }
  0x92   :  { %v109_v30 = vsub.f32 %v105_v28, %v107_v27  ;;  %v108_v31 = vsub.f32 %v104_v29, %v106_v24 }
  0x93   :  { %306 = vmatpush.msra.mxu1 %v283_v10  ;;  %370 = vmatpush.msra.mxu3 %v283_v10 }
  0x94   :  { %v111_v32 = vadd.f32 1e-05, %v109_v30  ;;  %v110_v33 = vadd.f32 1e-05, %v108_v31  ;;  %v278_v30 = vld [vmem:[#allocation8 + $0x8] sm:$0xff] }
  0x95   :  { %307 = vmatpush.msra.mxu1 %v282_v13  ;;  %371 = vmatpush.msra.mxu3 %v282_v13 }
  0x96   :  { %388 = vrsqrt.f32 %v111_v32  ;;  %vm118_vm1 = vweird.f32 %v110_v33  ;;  %vm128_vm3 = vweird.f32 %v111_v32 }
  0x97   :  { %390 = vrsqrt.f32 %v110_v33  ;;  %308 = vmatpush.msra.mxu1 %v281_v17  ;;  %372 = vmatpush.msra.mxu3 %v281_v17 }
  0x99   :  { %309 = vmatpush.msra.mxu1 %v280_v21  ;;  %373 = vmatpush.msra.mxu3 %v280_v21 }
  0x9b   :  { %310 = vmatpush.msra.mxu1 %v279_v25  ;;  %374 = vmatpush.msra.mxu3 %v279_v25 }
  0x9c   :  { %v389_v34 = vpop.eup %388 }
  0x9d   :  { %v391_v35 = vpop.eup %390  ;;  %v123_v36 = vmul.f32 %v389_v34, %v111_v32  ;;  %vm129_vm0 = vweird.f32 %v389_v34  ;;  %311 = vmatpush.msra.mxu1 %v278_v30  ;;  %375 = vmatpush.msra.mxu3 %v278_v30 }
  0x9e   :  { %v113_v37 = vmul.f32 %v391_v35, %v110_v33  ;;  %vm119_vm2 = vweird.f32 %v391_v35  ;;  %vm130_vm4 = vmor %vm128_vm3, %vm129_vm0 }
  0x9f   :  { %v124_v38 = vmul.f32 %v389_v34, %v123_v36  ;;  %vm120_vm5 = vmor %vm118_vm1, %vm119_vm2 }
  0xa0   :  { %v114_v39 = vmul.f32 %v391_v35, %v113_v37 }
  0xa1   :  { %v125_v40 = vmul.f32 0.5, %v124_v38 }
  0xa2   :  { %v115_v41 = vmul.f32 0.5, %v114_v39 }
  0xa3   :  { %v126_v42 = vsub.f32 1.5, %v125_v40 }
  0xa4   :  { %v116_v43 = vsub.f32 1.5, %v115_v41 }
  0xa5   :  { %v127_v44 = vmul.f32 %v389_v34, %v126_v42 }
  0xa6   :  { %v117_v46 = vmul.f32 %v391_v35, %v116_v43 }
  0xa7   :  { %v131_v49 = vsel %vm130_vm4, %v389_v34, %v127_v44  ;;  %v277_v34 = vld [vmem:[#allocation8] sm:$0xff] }
  0xa8   :  { %v121_v50 = vsel %vm120_vm5, %v391_v35, %v117_v46  ;;  %v135_v52 = vmul.f32 %v133_v45, %v131_v49  ;;  %312 = vmatpush.msra.mxu1 %v277_v34  ;;  %376 = vmatpush.msra.mxu3 %v277_v34 }
  0xa9   :  { %v134_v53 = vmul.f32 %v132_v48, %v121_v50 }
  0xaa   :  { %v140_v54 = vmul.f32 %v384_v47, %v135_v52 }
  0xab   :  { %v139_v55 = vmul.f32 %v384_v47, %v134_v53 }
  0xac   :  { %v145_v56 = vadd.f32 %v385_v51, %v140_v54 }
  0xad   :  { %v144_v57 = vadd.f32 %v385_v51, %v139_v55 }
  0xae   :  { %185 = vmatmul.f32.vlgmr.msra.gmra.mxu2 %v145_v56 }
  0xaf   :  { %182 = vmatmul.f32.vlgmr.msra.gmra.mxu0 %v144_v57 }
 0x12c   :  { %v183_v0 = vpop.f32.mrf.mxu0 }
 0x12d   :  { %v610_v2 = vadd.f32 %v386_v62, %v183_v0 }
 0x12f   :  { %v613_v5 = vmul.f32 0.70710677, %v610_v2 }
 0x131   :  { %v193_v7 = vmul.f32 %v613_v5, %v613_v5  ;;  %v186_v8 = vpop.f32.mrf.mxu2 }
 0x132   :  { %v617_v9 = vadd.f32 %v386_v62, %v186_v8 }
 0x133   :  { %v619_v11 = vmin.f32 %v193_v7, 16.0 }
 0x134   :  { %v622_v12 = vmul.f32 0.70710677, %v617_v9 }
 0x135   :  { %v195_v14 = vmul.f32 2.1237322e-06, %v619_v11  ;;  %v206_v15 = vmul.f32 3.8918573e-05, %v619_v11 }
 0x136   :  { %v233_v16 = vmul.f32 %v622_v12, %v622_v12 }
 0x137   :  { %v196_v18 = vadd.f32 0.00028619796, %v195_v14  ;;  %v207_v19 = vadd.f32 0.001143296, %v206_v15 }
 0x138   :  { %v234_v20 = vmin.f32 %v233_v16, 16.0 }
 0x139   :  { %v197_v22 = vmul.f32 %v196_v18, %v619_v11  ;;  %v208_v23 = vmul.f32 %v207_v19, %v619_v11 }
 0x13a   :  { %v235_v24 = vmul.f32 2.1237322e-06, %v234_v20  ;;  %v246_v26 = vmul.f32 3.8918573e-05, %v234_v20 }
 0x13b   :  { %v198_v27 = vadd.f32 0.0036580483, %v197_v22  ;;  %v209_v28 = vadd.f32 0.014752088, %v208_v23  ;;  %v189_v23 = vmul.f32 0.5, %v610_v2 }
 0x13c   :  { %v236_v29 = vadd.f32 0.00028619796, %v235_v24  ;;  %v247_v31 = vadd.f32 0.001143296, %v246_v26 }
 0x13d   :  { %v210_v32 = vmul.f32 %v209_v28, %v619_v11  ;;  %v199_v36 = vmul.f32 %v198_v27, %v619_v11 }
 0x13e   :  { %v237_v33 = vmul.f32 %v236_v29, %v234_v20  ;;  %v248_v35 = vmul.f32 %v247_v31, %v234_v20  ;;  %v190_v29 = vmul.f32 0.5, %v617_v9 }
 0x13f   :  { %v211_v37 = vadd.f32 0.112945676, %v210_v32  ;;  %v200_v42 = vadd.f32 0.05243302, %v199_v36  ;;  %v387_v32 = vld [vmem:[%s655_s6] ss:$0 sm:$0xff] }
 0x140   :  { %v238_v38 = vadd.f32 0.0036580483, %v237_v33  ;;  %v249_v39 = vadd.f32 0.014752088, %v248_v35 }
 0x141   :  { %v212_v40 = vmul.f32 %v211_v37, %v619_v11  ;;  %v201_v48 = vmul.f32 %v200_v42, %v619_v11 }
 0x142   :  { %v250_v41 = vmul.f32 %v249_v39, %v234_v20  ;;  %v239_v44 = vmul.f32 %v238_v38, %v234_v20 }
 0x143   :  { %v213_v43 = vadd.f32 0.4994258, %v212_v40  ;;  %v202_v53 = vadd.f32 0.18741608, %v201_v48 }
 0x144   :  { %v251_v45 = vadd.f32 0.112945676, %v250_v41  ;;  %v240_v50 = vadd.f32 0.05243302, %v239_v44 }
 0x145   :  { %v214_v46 = vmul.f32 %v213_v43, %v619_v11  ;;  %v203_v57 = vmul.f32 %v202_v53, %v619_v11 }
 0x146   :  { %v252_v47 = vmul.f32 %v251_v45, %v234_v20  ;;  %v241_v54 = vmul.f32 %v240_v50, %v234_v20 }
 0x147   :  { %v215_v49 = vadd.f32 1.0, %v214_v46  ;;  %v204_v61 = vadd.f32 1.1283791, %v203_v57 }
 0x148   :  { %v253_v51 = vadd.f32 0.4994258, %v252_v47  ;;  %v242_v58 = vadd.f32 0.18741608, %v241_v54 }
 0x149   :  { %392 = vrcp.f32 %v215_v49  ;;  %v227_v62 = vand.u32 2147483648, %v215_v49  ;;  %v225_v3 = vand.u32 2147483647, %v215_v49  ;;  %vm221_vm7 = vweird.f32 %v215_v49 }
 0x14a   :  { %v254_v52 = vmul.f32 %v253_v51, %v234_v20  ;;  %v243_v0 = vmul.f32 %v242_v58, %v234_v20  ;;  %v205_v7 = vmul.f32 %v204_v61, %v613_v5 }
 0x14b   :  { %v228_v8 = vor.u32 1.1754944e-38, %v227_v62  ;;  %vm226_vm9 = vcmp.eq.f32.partialorder %v225_v3, 8.507059e+37 }
 0x14c   :  { %v255_v55 = vadd.f32 1.0, %v254_v52  ;;  %v244_v13 = vadd.f32 1.1283791, %v243_v0 }
 0x14e   :  { %394 = vrcp.f32 %v255_v55  ;;  %v267_v14 = vand.u32 2147483648, %v255_v55  ;;  %v265_v17 = vand.u32 2147483647, %v255_v55  ;;  %vm261_vm11 = vweird.f32 %v255_v55 }
 0x14f   :  { %v393_v56 = vpop.eup %392  ;;  %v245_v22 = vmul.f32 %v244_v13, %v622_v12 }
 0x150   :  { %v217_v59 = vmul.f32 %v393_v56, %v215_v49  ;;  %vm222_vm6 = vweird.f32 %v393_v56  ;;  %v268_v21 = vor.u32 1.1754944e-38, %v267_v14  ;;  %vm266_vm13 = vcmp.eq.f32.partialorder %v265_v17, 8.507059e+37 }
 0x151   :  { %vm223_vm8 = vmor %vm221_vm7, %vm222_vm6 }
 0x152   :  { %v218_v60 = vsub.f32 1.0, %v217_v59 }
 0x154   :  { %v395_v63 = vpop.eup %394  ;;  %v219_v1 = vmul.f32 %v393_v56, %v218_v60 }
 0x155   :  { %v257_v4 = vmul.f32 %v395_v63, %v255_v55  ;;  %vm262_vm10 = vweird.f32 %v395_v63 }
 0x156   :  { %v220_v6 = vadd.f32 %v393_v56, %v219_v1  ;;  %vm263_vm12 = vmor %vm261_vm11, %vm262_vm10 }
 0x157   :  { %v258_v10 = vsub.f32 1.0, %v257_v4 }
 0x158   :  { %v224_v11 = vsel %vm223_vm8, %v393_v56, %v220_v6 }
 0x159   :  { %v229_v15 = vsel %vm226_vm9, %v228_v8, %v224_v11  ;;  %v259_v16 = vmul.f32 %v395_v63, %v258_v10 }
 0x15a   :  { %v230_v18 = vmul.f32 %v229_v15, %v205_v7 }
 0x15b   :  { %v260_v19 = vadd.f32 %v395_v63, %v259_v16 }
 0x15c   :  { %v343_v20 = vclamps-f32 %v230_v18, 1.0 }
 0x15d   :  { %v264_v5 = vsel %vm263_vm12, %v395_v63, %v260_v19 }
 0x15e   :  { %v273_v24 = vadd.f32 1.0, %v343_v20  ;;  %v269_v25 = vsel %vm266_vm13, %v268_v21, %v264_v5 }
 0x15f   :  { %v270_v26 = vmul.f32 %v269_v25, %v245_v22 }
 0x160   :  { %v275_v27 = vmul.f32 %v273_v24, %v189_v23 }
 0x161   :  { %v344_v28 = vclamps-f32 %v270_v26, 1.0 }
 0x162   :  { %313 = vmatmul.f32.vlgmr.msra.gmra.mxu1 %v275_v27 }
 0x163   :  { %v274_v30 = vadd.f32 1.0, %v344_v28 }
 0x165   :  { %v276_v31 = vmul.f32 %v274_v30, %v190_v29 }
 0x167   :  { %316 = vmatmul.f32.vlgmr.msra.gmra.mxu3 %v276_v31 }
 0x1df   :  { %v314_v12 = vpop.f32.mrf.mxu1 }
 0x1e0   :  { %v315_v33 = vadd.f32 %v387_v32, %v314_v12 }
 0x1e2   :  { %320 = vst [vmem:[#allocation10] sm:$0xff] %v315_v33 }
 0x1ea   :  { %v317_v2 = vpop.f32.mrf.mxu3 }
 0x1eb   :  { %v318_v34 = vadd.f32 %v387_v32, %v317_v2 }
 0x1ed   :  { %321 = vst [vmem:[#allocation10 + $0x8] sm:$0xff] %v318_v34 }
 0x1ee   :  { %334 = dma.vmem_to_hbm [thread:$0]  %s327_s24, 256, %s329_s27, [#allocation4], %s526_s11, %s526_s11, %s527_s12  }
 0x1ef   :  { %522 = dma.done.wait [#allocation4], 256  }
 0x1f0   :  { %523 = vsyncadd [#allocation4], 4294967040 }
 0x1f1   :  { %339 = vsyncpa [#allocation3], 1 }
 0x1f2   :  { %340 = vsyncpa [#allocation6], 1 }
 0x1f3   :  { %341 = vsyncpa [#allocation9], 1 }
 0x1f4   :  { %342 = vsyncpa [#allocation4], 1 }

</bundles_post_ra>
